<compile_context>
chip_gen: v7x
topology: tpu7x:2x2x1
jax: 0.10.0
libtpu: 0.0.40
codegen_flags: <defaults>
</compile_context>

<pallas_src>
import functools

import jax
import jax.numpy as jnp
from jax import lax
from jax.experimental import pallas as pl
from jax.experimental.pallas import tpu as pltpu


def _round_up(a: int, b: int) -> int:
    return (a + b - 1) // b * b


def _vmem_capacity_bytes() -> int:
    """Physical VMEM of the current TPU generation (conservative fallback = v7x 64 MiB)."""
    try:
        cap = int(getattr(pltpu.get_tpu_info(), "vmem_capacity_bytes"))
        if cap > 0:
            return cap
    except Exception:
        pass
    return 64 << 20


def _pick_batch_pack(n: int, c_in: int) -> int:
    """How many batch elements to stack on the sublane axis of one tile."""
    if c_in >= 8 or n <= 1:
        return 1
    best = 1
    for cand in range(2, min(n, 8) + 1):
        if n % cand == 0 and cand * c_in <= 32:
            best = cand
    return best


def _causal_conv1d_kernel(w_ref, b_ref, x_ref, o_ref, *scratch,
                          kernel_size, dilation, pad, time_tile, b_sub):
    # w_ref: (K, C_in, C_out_p)        resident weight, contraction dim (C_in) on sublanes
    # b_ref: (C_out_p, 1)              f32 bias
    # x_ref: (B_sub, C_in, TL)         current time tile of B_sub batch elements
    # o_ref: (B_sub, C_out_p, TL)
    # scratch[0] (if pad>0): (B_sub, C_in, pad) halo = last `pad` input cols of prev tile
    t = pl.program_id(1)
    halo_ref = scratch[0] if pad > 0 else None

    if pad > 0:
        # First time tile of each batch block: the causal left context is all zeros.
        @pl.when(t == 0)
        def _zero_halo():
            halo_ref[...] = jnp.zeros(halo_ref.shape, halo_ref.dtype)

    bias = b_ref[...]                                    # (C_out_p, 1) f32

    for bs in range(b_sub):
        x_b = x_ref[bs]                                  # (C_in, TL)
        h_b = halo_ref[bs] if pad > 0 else None          # (C_in, pad)

        acc = None
        for k in range(kernel_size):
            shift = pad - k * dilation                   # left shift of tap k
            if shift == 0:
                tap = x_b                                # last tap: zero-copy
            elif shift >= time_tile:
                tap = h_b[:, k * dilation:k * dilation + time_tile]
            else:
                # tap_k = [ halo cols k*dil .. pad ) ++ x cols [0 .. TL-shift )
                tap = jnp.concatenate(
                    [h_b[:, k * dilation:], x_b[:, :time_tile - shift]], axis=1)
            # Contract dim 0 of both operands (C_in on sublanes for both) -> (C_out_p, TL).
            part = lax.dot_general(w_ref[k], tap,
                                   dimension_numbers=(((0,), (0,)), ((), ())),
                                   preferred_element_type=jnp.float32)
            acc = part if acc is None else acc + part

        o_ref[bs] = (acc + bias).astype(o_ref.dtype)

        if pad > 0:
            # Carry the last `pad` input columns into the next time tile of this batch block.
            halo_ref[bs] = x_b[:, time_tile - pad:]


def causal_conv1d(x, weight, bias, *, dilation=1, time_tile=None, compute_dtype=None):
    """x: (N, C_in, L), weight: (C_out, C_in, K), bias: (C_out,) -> (N, C_out, L)."""
    n, c_in, length = x.shape
    c_out, c_in_w, k = weight.shape
    assert c_in == c_in_w
    pad = (k - 1) * dilation

    out_dtype = x.dtype
    compute_dtype = jnp.dtype(compute_dtype) if compute_dtype is not None else jnp.dtype(x.dtype)
    bytes_c = compute_dtype.itemsize
    bytes_o = jnp.dtype(out_dtype).itemsize

    c_out_p = _round_up(c_out, 8)                  # sublane-dense output channels
    b_sub = _pick_batch_pack(n, c_in)              # batches stacked per tile (sublane density)

    # ---- generation-aware tile sizing & VMEM budget ----
    cap = _vmem_capacity_bytes()
    budget = cap // 2                              # leave headroom for compiler temps
    fixed = (2 * k * c_in * c_out_p * bytes_c      # resident weight (double-buffered)
             + b_sub * c_in * max(pad, 1) * bytes_c  # halo scratch
             + 2 * c_out_p * 4                     # bias
             + (2 << 20))                          # slack
    per_col = (2 * b_sub * c_in * bytes_c          # x double-buffer
               + 2 * b_sub * c_out_p * bytes_o     # out double-buffer
               + k * c_in * bytes_c                # tap temporaries (worst case all live)
               + 2 * c_out_p * 4)                  # f32 accumulator + partial
    tl_max = max(128, (max(budget - fixed, 0) // per_col) // 128 * 128)

    if time_tile is None:
        # small channel counts -> bigger tiles to amortize the ~0.35us per-step overhead
        time_tile = 4096 if b_sub * c_in * bytes_c <= 64 else 1024
    tl = min(_round_up(time_tile, 128), tl_max, _round_up(length, 128))
    if pad > 0:
        tl = max(tl, _round_up(pad, 128))          # single-tile halo must cover `pad`
    tl = max(tl, 128)
    l_pad = _round_up(length, tl)                  # right-pad only if L not tile-aligned

    est = fixed + per_col * tl
    vmem_limit = int(min(cap * 9 // 10, max(32 << 20, 2 * est)))

    # ---- host-side prep (done once, cheap) ----
    #  * weight transposed to (K, C_in, C_out_p): contraction dim on sublanes, no per-tile transpose
    #  * NO causal left pad of x (handled by the in-kernel halo); right pad only for alignment
    #  * optional bf16 cast of x / weight (halves HBM + VMEM); bias + accumulation stay f32
    w_f = jnp.transpose(weight, (2, 1, 0))                                   # (K, C_in, C_out)
    w_f = jnp.pad(w_f, ((0, 0), (0, 0), (0, c_out_p - c_out))).astype(compute_dtype)
    b2 = jnp.pad(bias, (0, c_out_p - c_out)).reshape(c_out_p, 1).astype(jnp.float32)
    x_in = x
    if l_pad != length:
        x_in = jnp.pad(x_in, ((0, 0), (0, 0), (0, l_pad - length)))
    if x_in.dtype != compute_dtype:
        x_in = x_in.astype(compute_dtype)

    kernel = functools.partial(
        _causal_conv1d_kernel,
        kernel_size=k, dilation=dilation, pad=pad, time_tile=tl, b_sub=b_sub,
    )

    # Grid order matters: time must be the LAST axis and "arbitrary" (sequential halo carry).
    grid = (n // b_sub, l_pad // tl)
    scratch = [pltpu.VMEM((b_sub, c_in, pad), compute_dtype)] if pad > 0 else []

    cost = pl.CostEstimate(
        flops=2 * n * c_out_p * c_in * k * l_pad,
        transcendentals=0,
        bytes_accessed=(n * c_in * l_pad * bytes_c
                        + k * c_in * c_out_p * bytes_c
                        + n * c_out_p * l_pad * bytes_o),
    )

    out = pl.pallas_call(
        kernel,
        out_shape=jax.ShapeDtypeStruct((n, c_out_p, l_pad), out_dtype),
        grid_spec=pltpu.PrefetchScalarGridSpec(
            num_scalar_prefetch=0,
            grid=grid,
            in_specs=[
                pl.BlockSpec((k, c_in, c_out_p), lambda b, t: (0, 0, 0)),  # weight (resident)
                pl.BlockSpec((c_out_p, 1), lambda b, t: (0, 0)),           # bias
                pl.BlockSpec((b_sub, c_in, tl), lambda b, t: (b, 0, t)),   # x: B_sub batches, one time tile
            ],
            out_specs=pl.BlockSpec((b_sub, c_out_p, tl), lambda b, t: (b, 0, t)),
            scratch_shapes=scratch,
        ),
        compiler_params=pltpu.CompilerParams(
            # Batch blocks independent (megacore); time carries the causal halo -> arbitrary.
            dimension_semantics=("parallel", "arbitrary"),
            vmem_limit_bytes=vmem_limit,
        ),
        cost_estimate=cost,
    )(w_f, b2, x_in)

    if c_out_p == c_out and l_pad == length:
        return out                                  # no host-side re-copy when already aligned
    return out[:, :c_out, :length]


def _reference_causal_conv1d(x, weight, bias, *, dilation=1):
    """Pure-JAX reference matching PyTorch conv1d(padding=pad)(x)[..., :-pad]."""
    n, c_in, length = x.shape
    c_out, _, k = weight.shape
    pad = (k - 1) * dilation
    x_pad = jnp.pad(x, ((0, 0), (0, 0), (pad, 0)))
    out = jnp.zeros((n, c_out, length), jnp.float32)
    for kk in range(k):
        x_k = x_pad[:, :, kk * dilation: kk * dilation + length]  # (N, C_in, L)
        out = out + jnp.einsum("oc,ncl->nol", weight[:, :, kk], x_k)
    return out + bias.reshape(1, c_out, 1)


if __name__ == "__main__":
    # Small shapes implied by the module's forward: (N, C_in, L) conv input.
    N, C_IN, C_OUT, L = 2, 4, 6, 16
    KERNEL_SIZE, DILATION = 3, 2

    key = jax.random.PRNGKey(0)
    kx, kw, kb = jax.random.split(key, 3)
    x = jax.random.normal(kx, (N, C_IN, L), dtype=jnp.float32)
    weight = jax.random.normal(kw, (C_OUT, C_IN, KERNEL_SIZE), dtype=jnp.float32) * 0.1
    bias = jax.random.normal(kb, (C_OUT,), dtype=jnp.float32) * 0.1

    y = jax.block_until_ready(causal_conv1d(x, weight, bias, dilation=DILATION))
    y_ref = _reference_causal_conv1d(x, weight, bias, dilation=DILATION)
    assert y.shape == (N, C_OUT, L)
    assert jnp.allclose(y, y_ref, atol=1e-5, rtol=1e-5), float(jnp.max(jnp.abs(y - y_ref)))

    # Multi-tile check: exercises the causal halo carried across time tiles (3 tiles of 128)
    # and the batch packing (B_sub = 2 for C_in = 4).
    L2 = 384
    x2 = jax.random.normal(jax.random.PRNGKey(1), (N, C_IN, L2), dtype=jnp.float32)
    y2 = jax.block_until_ready(
        causal_conv1d(x2, weight, bias, dilation=DILATION, time_tile=128))
    y2_ref = _reference_causal_conv1d(x2, weight, bias, dilation=DILATION)
    assert y2.shape == (N, C_OUT, L2)
    assert jnp.allclose(y2, y2_ref, atol=1e-5, rtol=1e-5), float(jnp.max(jnp.abs(y2 - y2_ref)))

    # bf16 operand path (f32 accumulation): looser tolerance — expected precision change.
    y3 = jax.block_until_ready(
        causal_conv1d(x2, weight, bias, dilation=DILATION, time_tile=128,
                      compute_dtype=jnp.bfloat16))
    assert y3.shape == (N, C_OUT, L2)
    assert jnp.allclose(y3, y2_ref, atol=5e-2, rtol=5e-2), float(jnp.max(jnp.abs(y3 - y2_ref)))

    print("KERNEL_OK")
</pallas_src>

<mosaic_0001>
module attributes {stable_mosaic.version = 11 : i64} {
  func.func @_causal_conv1d_kernel(%arg0: i32, %arg1: i32, %arg2: memref<3x4x8xf32, #tpu.memory_space<vmem>>, %arg3: memref<8x1xf32, #tpu.memory_space<vmem>>, %arg4: memref<2x4x128xf32, #tpu.memory_space<vmem>>, %arg5: memref<2x8x128xf32, #tpu.memory_space<vmem>>, %arg6: memref<2x4x4xf32, #tpu.memory_space<vmem>>) attributes {dimension_semantics = [#tpu.dimension_semantics<parallel>, #tpu.dimension_semantics<arbitrary>], iteration_bounds = array<i64: 1, 1>, scalar_prefetch = 0 : i64, scratch_operands = 1 : i64, tpu.core_type = #tpu.core_type<tc>, window_params = [{pipeline_mode = #tpu.pipeline_mode<synchronous>, transform_indices = @transform_0, window_bounds = array<i64: 3, 4, 8>}, {pipeline_mode = #tpu.pipeline_mode<synchronous>, transform_indices = @transform_1, window_bounds = array<i64: 8, 1>}, {transform_indices = @transform_2, window_bounds = array<i64: 2, 4, 128>}, {transform_indices = @transform_3, window_bounds = array<i64: 2, 8, 128>}]} {
    %c0_i32 = arith.constant 0 : i32
    %0 = arith.cmpi eq, %arg1, %c0_i32 : i32
    %1 = arith.extui %0 : i1 to i32
    %c0_i32_0 = arith.constant 0 : i32
    %2 = arith.cmpi ne, %1, %c0_i32_0 : i32
    scf.if %2 {
      %cst_47 = arith.constant 0.000000e+00 : f32
      %62 = vector.broadcast %cst_47 : f32 to vector<2x4x4xf32>
      %c0_48 = arith.constant 0 : index
      %c0_49 = arith.constant 0 : index
      %c0_50 = arith.constant 0 : index
      %63 = vector.load %arg6[%c0_48, %c0_49, %c0_50] : memref<2x4x4xf32, #tpu.memory_space<vmem>>, vector<2x4x4xf32>
      tpu.vector_store %arg6[%c0_48, %c0_49, %c0_50], %62 {strides = array<i32>} : memref<2x4x4xf32, #tpu.memory_space<vmem>>, vector<2x4x4xf32>,
    } else {
    }
    %c0 = arith.constant 0 : index
    %c0_1 = arith.constant 0 : index
    %3 = vector.load %arg3[%c0, %c0_1] : memref<8x1xf32, #tpu.memory_space<vmem>>, vector<8x1xf32>
    %c0_2 = arith.constant 0 : index
    %c0_3 = arith.constant 0 : index
    %c0_4 = arith.constant 0 : index
    %4 = vector.load %arg4[%c0_2, %c0_3, %c0_4] : memref<2x4x128xf32, #tpu.memory_space<vmem>>, vector<1x4x128xf32>
    %5 = vector.shape_cast %4 : vector<1x4x128xf32> to vector<4x128xf32>
    %c0_5 = arith.constant 0 : index
    %c0_6 = arith.constant 0 : index
    %c0_7 = arith.constant 0 : index
    %6 = vector.load %arg6[%c0_5, %c0_6, %c0_7] : memref<2x4x4xf32, #tpu.memory_space<vmem>>, vector<1x4x4xf32>
    %7 = vector.shape_cast %6 : vector<1x4x4xf32> to vector<4x4xf32>
    %8 = vector.extract_strided_slice %5 {offsets = [0, 0], sizes = [4, 124], strides = [1, 1]} : vector<4x128xf32> to vector<4x124xf32>
    %9 = tpu.concatenate %7, %8 in 1 : vector<4x4xf32>, vector<4x124xf32> -> vector<4x128xf32>
    %c0_8 = arith.constant 0 : index
    %c0_9 = arith.constant 0 : index
    %c0_10 = arith.constant 0 : index
    %10 = vector.load %arg2[%c0_8, %c0_9, %c0_10] : memref<3x4x8xf32, #tpu.memory_space<vmem>>, vector<1x4x8xf32>
    %11 = vector.shape_cast %10 : vector<1x4x8xf32> to vector<4x8xf32>
    %cst = arith.constant dense<0.000000e+00> : vector<8x128xf32>
    %12 = tpu.matmul %11, %9, %cst {dimension_numbers = #tpu.dot_dimension_numbers<[0], [0], [1], [1], [0, 1, 1, 1], [], []>} : vector<4x8xf32>, vector<4x128xf32>, vector<8x128xf32> -> vector<8x128xf32>
    %13 = vector.extract_strided_slice %7 {offsets = [0, 2], sizes = [4, 2], strides = [1, 1]} : vector<4x4xf32> to vector<4x2xf32>
    %14 = vector.extract_strided_slice %5 {offsets = [0, 0], sizes = [4, 126], strides = [1, 1]} : vector<4x128xf32> to vector<4x126xf32>
    %15 = tpu.concatenate %13, %14 in 1 : vector<4x2xf32>, vector<4x126xf32> -> vector<4x128xf32>
    %c1 = arith.constant 1 : index
    %c0_11 = arith.constant 0 : index
    %c0_12 = arith.constant 0 : index
    %16 = vector.load %arg2[%c1, %c0_11, %c0_12] : memref<3x4x8xf32, #tpu.memory_space<vmem>>, vector<1x4x8xf32>
    %17 = vector.shape_cast %16 : vector<1x4x8xf32> to vector<4x8xf32>
    %cst_13 = arith.constant dense<0.000000e+00> : vector<8x128xf32>
    %18 = tpu.matmul %17, %15, %cst_13 {dimension_numbers = #tpu.dot_dimension_numbers<[0], [0], [1], [1], [0, 1, 1, 1], [], []>} : vector<4x8xf32>, vector<4x128xf32>, vector<8x128xf32> -> vector<8x128xf32>
    %19 = arith.addf %12, %18 : vector<8x128xf32>
    %c2 = arith.constant 2 : index
    %c0_14 = arith.constant 0 : index
    %c0_15 = arith.constant 0 : index
    %20 = vector.load %arg2[%c2, %c0_14, %c0_15] : memref<3x4x8xf32, #tpu.memory_space<vmem>>, vector<1x4x8xf32>
    %21 = vector.shape_cast %20 : vector<1x4x8xf32> to vector<4x8xf32>
    %cst_16 = arith.constant dense<0.000000e+00> : vector<8x128xf32>
    %22 = tpu.matmul %21, %5, %cst_16 {dimension_numbers = #tpu.dot_dimension_numbers<[0], [0], [1], [1], [0, 1, 1, 1], [], []>} : vector<4x8xf32>, vector<4x128xf32>, vector<8x128xf32> -> vector<8x128xf32>
    %23 = arith.addf %19, %22 : vector<8x128xf32>
    %24 = vector.broadcast %3 : vector<8x1xf32> to vector<8x128xf32>
    %25 = arith.addf %23, %24 : vector<8x128xf32>
    %c0_17 = arith.constant 0 : index
    %c0_18 = arith.constant 0 : index
    %c0_19 = arith.constant 0 : index
    %26 = vector.load %arg5[%c0_17, %c0_18, %c0_19] : memref<2x8x128xf32, #tpu.memory_space<vmem>>, vector<1x8x128xf32>
    %27 = vector.shape_cast %26 : vector<1x8x128xf32> to vector<8x128xf32>
    %28 = vector.shape_cast %25 : vector<8x128xf32> to vector<1x8x128xf32>
    tpu.vector_store %arg5[%c0_17, %c0_18, %c0_19], %28 {strides = array<i32>} : memref<2x8x128xf32, #tpu.memory_space<vmem>>, vector<1x8x128xf32>,
    %29 = vector.extract_strided_slice %5 {offsets = [0, 124], sizes = [4, 4], strides = [1, 1]} : vector<4x128xf32> to vector<4x4xf32>
    %c0_20 = arith.constant 0 : index
    %c0_21 = arith.constant 0 : index
    %c0_22 = arith.constant 0 : index
    %30 = vector.load %arg6[%c0_20, %c0_21, %c0_22] : memref<2x4x4xf32, #tpu.memory_space<vmem>>, vector<1x4x4xf32>
    %31 = vector.shape_cast %30 : vector<1x4x4xf32> to vector<4x4xf32>
    %32 = vector.shape_cast %29 : vector<4x4xf32> to vector<1x4x4xf32>
    tpu.vector_store %arg6[%c0_20, %c0_21, %c0_22], %32 {strides = array<i32>} : memref<2x4x4xf32, #tpu.memory_space<vmem>>, vector<1x4x4xf32>,
    %c1_23 = arith.constant 1 : index
    %c0_24 = arith.constant 0 : index
    %c0_25 = arith.constant 0 : index
    %33 = vector.load %arg4[%c1_23, %c0_24, %c0_25] : memref<2x4x128xf32, #tpu.memory_space<vmem>>, vector<1x4x128xf32>
    %34 = vector.shape_cast %33 : vector<1x4x128xf32> to vector<4x128xf32>
    %c1_26 = arith.constant 1 : index
    %c0_27 = arith.constant 0 : index
    %c0_28 = arith.constant 0 : index
    %35 = vector.load %arg6[%c1_26, %c0_27, %c0_28] : memref<2x4x4xf32, #tpu.memory_space<vmem>>, vector<1x4x4xf32>
    %36 = vector.shape_cast %35 : vector<1x4x4xf32> to vector<4x4xf32>
    %37 = vector.extract_strided_slice %34 {offsets = [0, 0], sizes = [4, 124], strides = [1, 1]} : vector<4x128xf32> to vector<4x124xf32>
    %38 = tpu.concatenate %36, %37 in 1 : vector<4x4xf32>, vector<4x124xf32> -> vector<4x128xf32>
    %c0_29 = arith.constant 0 : index
    %c0_30 = arith.constant 0 : index
    %c0_31 = arith.constant 0 : index
    %39 = vector.load %arg2[%c0_29, %c0_30, %c0_31] : memref<3x4x8xf32, #tpu.memory_space<vmem>>, vector<1x4x8xf32>
    %40 = vector.shape_cast %39 : vector<1x4x8xf32> to vector<4x8xf32>
    %cst_32 = arith.constant dense<0.000000e+00> : vector<8x128xf32>
    %41 = tpu.matmul %40, %38, %cst_32 {dimension_numbers = #tpu.dot_dimension_numbers<[0], [0], [1], [1], [0, 1, 1, 1], [], []>} : vector<4x8xf32>, vector<4x128xf32>, vector<8x128xf32> -> vector<8x128xf32>
    %42 = vector.extract_strided_slice %36 {offsets = [0, 2], sizes = [4, 2], strides = [1, 1]} : vector<4x4xf32> to vector<4x2xf32>
    %43 = vector.extract_strided_slice %34 {offsets = [0, 0], sizes = [4, 126], strides = [1, 1]} : vector<4x128xf32> to vector<4x126xf32>
    %44 = tpu.concatenate %42, %43 in 1 : vector<4x2xf32>, vector<4x126xf32> -> vector<4x128xf32>
    %c1_33 = arith.constant 1 : index
    %c0_34 = arith.constant 0 : index
    %c0_35 = arith.constant 0 : index
    %45 = vector.load %arg2[%c1_33, %c0_34, %c0_35] : memref<3x4x8xf32, #tpu.memory_space<vmem>>, vector<1x4x8xf32>
    %46 = vector.shape_cast %45 : vector<1x4x8xf32> to vector<4x8xf32>
    %cst_36 = arith.constant dense<0.000000e+00> : vector<8x128xf32>
    %47 = tpu.matmul %46, %44, %cst_36 {dimension_numbers = #tpu.dot_dimension_numbers<[0], [0], [1], [1], [0, 1, 1, 1], [], []>} : vector<4x8xf32>, vector<4x128xf32>, vector<8x128xf32> -> vector<8x128xf32>
    %48 = arith.addf %41, %47 : vector<8x128xf32>
    %c2_37 = arith.constant 2 : index
    %c0_38 = arith.constant 0 : index
    %c0_39 = arith.constant 0 : index
    %49 = vector.load %arg2[%c2_37, %c0_38, %c0_39] : memref<3x4x8xf32, #tpu.memory_space<vmem>>, vector<1x4x8xf32>
    %50 = vector.shape_cast %49 : vector<1x4x8xf32> to vector<4x8xf32>
    %cst_40 = arith.constant dense<0.000000e+00> : vector<8x128xf32>
    %51 = tpu.matmul %50, %34, %cst_40 {dimension_numbers = #tpu.dot_dimension_numbers<[0], [0], [1], [1], [0, 1, 1, 1], [], []>} : vector<4x8xf32>, vector<4x128xf32>, vector<8x128xf32> -> vector<8x128xf32>
    %52 = arith.addf %48, %51 : vector<8x128xf32>
    %53 = vector.broadcast %3 : vector<8x1xf32> to vector<8x128xf32>
    %54 = arith.addf %52, %53 : vector<8x128xf32>
    %c1_41 = arith.constant 1 : index
    %c0_42 = arith.constant 0 : index
    %c0_43 = arith.constant 0 : index
    %55 = vector.load %arg5[%c1_41, %c0_42, %c0_43] : memref<2x8x128xf32, #tpu.memory_space<vmem>>, vector<1x8x128xf32>
    %56 = vector.shape_cast %55 : vector<1x8x128xf32> to vector<8x128xf32>
    %57 = vector.shape_cast %54 : vector<8x128xf32> to vector<1x8x128xf32>
    tpu.vector_store %arg5[%c1_41, %c0_42, %c0_43], %57 {strides = array<i32>} : memref<2x8x128xf32, #tpu.memory_space<vmem>>, vector<1x8x128xf32>,
    %58 = vector.extract_strided_slice %34 {offsets = [0, 124], sizes = [4, 4], strides = [1, 1]} : vector<4x128xf32> to vector<4x4xf32>
    %c1_44 = arith.constant 1 : index
    %c0_45 = arith.constant 0 : index
    %c0_46 = arith.constant 0 : index
    %59 = vector.load %arg6[%c1_44, %c0_45, %c0_46] : memref<2x4x4xf32, #tpu.memory_space<vmem>>, vector<1x4x4xf32>
    %60 = vector.shape_cast %59 : vector<1x4x4xf32> to vector<4x4xf32>
    %61 = vector.shape_cast %58 : vector<4x4xf32> to vector<1x4x4xf32>
    tpu.vector_store %arg6[%c1_44, %c0_45, %c0_46], %61 {strides = array<i32>} : memref<2x4x4xf32, #tpu.memory_space<vmem>>, vector<1x4x4xf32>,
    return
  }
  func.func @transform_0(%arg0: i32, %arg1: i32) -> (i32, i32, i32) {
    %c0_i32 = arith.constant 0 : i32
    %c0_i32_0 = arith.constant 0 : i32
    %c0_i32_1 = arith.constant 0 : i32
    %c0_i32_2 = arith.constant 0 : i32
    return %c0_i32, %c0_i32_0, %c0_i32_1 : i32, i32, i32
  }
  func.func @transform_1(%arg0: i32, %arg1: i32) -> (i32, i32) {
    %c0_i32 = arith.constant 0 : i32
    %c0_i32_0 = arith.constant 0 : i32
    %c0_i32_1 = arith.constant 0 : i32
    return %c0_i32, %c0_i32_0 : i32, i32
  }
  func.func @transform_2(%arg0: i32, %arg1: i32) -> (i32, i32, i32) {
    %c0_i32 = arith.constant 0 : i32
    %c0_i32_0 = arith.constant 0 : i32
    return %arg0, %c0_i32, %arg1 : i32, i32, i32
  }
  func.func @transform_3(%arg0: i32, %arg1: i32) -> (i32, i32, i32) {
    %c0_i32 = arith.constant 0 : i32
    %c0_i32_0 = arith.constant 0 : i32
    return %arg0, %c0_i32, %arg1 : i32, i32, i32
  }
}

</mosaic_0001>

<bundles_post_ra>
// kernel: tpu_custom_call.1
= control target key start
LH: loop header
LB: loop body
LE: loop exit
PB: predicated region body
PF: predicated region fallthrough
CT: control target
= control target key end

     0   :  { %8 = vsyncpa [#allocation4], 0  ;;  %s977_s0 = inlined_call_operand.hbm [shape: f32[3,4,8], index: 0, kind: input, shape index: {}]   ;;  %s978_s1 = inlined_call_operand.vmem [shape: f32[8,1], index: 1, kind: input, shape index: {}]   ;;  %s979_s2 = inlined_call_operand.vmem [shape: f32[2,4,128], index: 2, kind: input, shape index: {}]   ;;  %s980_s3 = inlined_call_operand.hbm [shape: f32[2,8,128], index: 3, kind: output, shape index: {}]  }
   0x1   :  { %9 = vsyncpa [#allocation5], 0  ;;  %s873_s12 = smov [#allocation3]   ;;  %s825_s16 = scalar_lea.hbm %s977_s0, 192 }
   0x2   :  { %s15_s13 = sshll.u32 %s873_s12, 4  ;;  %p826_p0 = scmp.ne.s32.totalorder %s977_s0, %s825_s16  ;;  %s16_s13 = int_to_ptr.vmem [resolvable:$true] %s15_s13 }
   0x3   :  { %p829_p1 = scmp.lt.u32.totalorder %s825_s16, %s977_s0 }
   0x5   :  { %p831_p2 = pnand %p829_p1, %p826_p0 }
   0x7   :  { %834 = shalt.err (!%p831_p2)
}
   0x8   :  { %s835_s21 = scalar_lea.vmem %s16_s13, 192  ;;  %p840_p4 = scmp.lt.s32.totalorder %s16_s13, %s16_s13 }
   0x9   :  { %p836_p3 = scmp.ne.s32.totalorder %s16_s13, %s835_s21  ;;  %p841_p5 = scmp.lt.s32.totalorder %s835_s21, %s835_s21 }
   0xb   :  { %p842_p6 = por %p841_p5, %p840_p4 }
   0xd   :  { %p843_p7 = pnand %p842_p6, %p836_p3 }
   0xf   :  { %846 = shalt.err (!%p843_p7)
}
  0x10   :  { %s874_s22 = smov 64   ;;  %s875_s23 = smov 4  }
  0x11   :  { %21 = dma.hbm_to_vmem [thread:$0]  %s977_s0, 192, %s16_s13, [#allocation4], %s874_s22, %s874_s22, %s875_s23  }
  0x12   :  { %869 = dma.done.wait [#allocation4], 192  }
  0x13   :  { %870 = vsyncadd [#allocation4], 4294967104  ;;  %vm33_vm0 = vcmask 27648   ;;  %v876_v0 = vmov 0.0   ;;  %vm877_vm1 = vmmov 0   ;;  %s878_s27 = smov 2  }
  0x14   :  { %35 = vst.msk [vmem:[#allocation2 + $0x4] sm:$0xf] %vm33_vm0, %v876_v0  ;;  %34 = vst.msk [vmem:[#allocation2] sm:$0xf] %vm33_vm0, %v876_v0  ;;  %788 = vmatprep.subr.mxu1 %v876_v0  ;;  %783 = vmatprep.subr.mxu0 %v876_v0  ;;  %v37_v1 = vld [vmem:[%s979_s2] sm:$0xf] }
  0x15   :  { %785 = vmatprep.mubr.msk.f32.mxu0 %vm877_vm1, %v876_v0  ;;  %790 = vmatprep.mubr.msk.f32.mxu1 %vm877_vm1, %v876_v0  ;;  %v764_v2 = vld [vmem:[%s979_s2 + $0x4] sm:$0xf]  ;;  %s879_s30 = smov 126   ;;  %v56_v5 = vld [vmem:[#allocation3 + $0x4] sm:$0xf]  ;;  %v880_v12 = vmov 0  }
  0x16   :  { %40 = vrot.lane.b32.xlu1 %v37_v1, %s875_s23  ;;  %50 = vrot.lane.b32.xlu0 %v37_v1, %s878_s27  ;;  %v275_v6 = vld [vmem:[#allocation3 + $0x8] sm:$0xf]  ;;  %v411_v7 = vld [vmem:[#allocation3 + $0x4] sm:$0xf]  ;;  %v45_v8 = vld [vmem:[#allocation3] sm:$0xf] }
  0x17   :  { %v402_v9 = vld [vmem:[#allocation3] sm:$0xf]  ;;  %v628_v10 = vld [vmem:[#allocation3 + $0x8] sm:$0xf]  ;;  %v36_v11 = vld [vmem:[%s978_s1] sm:$0xff]  ;;  %vm43_vm2 = vcmask 31744  }
  0x18   :  { %vm92_vm3 = vcmask 1043456   ;;  %vm53_vm4 = vcmask 15360   ;;  %s881_s1 = smov [#allocation6]  }
  0x19   :  { %s746_s5 = sshll.u32 %s881_s1, 4  ;;  %s747_s5 = int_to_ptr.vmem [resolvable:$true] %s746_s5 }
  0x1a   :  { %398 = vrot.lane.b32.xlu1 %v764_v2, %s875_s23  ;;  %407 = vrot.lane.b32.xlu0 %v764_v2, %s878_s27  ;;  %s847_s6 = scalar_lea.vmem %s747_s5, 256  ;;  %p852_p9 = scmp.lt.s32.totalorder %s747_s5, %s747_s5 }
  0x1b   :  { %v396_v3 = vld [vmem:[#allocation2 + $0x4] sm:$0xf]  ;;  %v38_v4 = vld [vmem:[#allocation2] sm:$0xf]  ;;  %p848_p8 = scmp.ne.s32.totalorder %s747_s5, %s847_s6  ;;  %p853_p10 = scmp.lt.s32.totalorder %s847_s6, %s847_s6 }
  0x1d   :  { %p854_p11 = por %p853_p10, %p852_p9 }
  0x1e   :  { %404 = vrot.lane.b32.xlu1 %v396_v3, %s879_s30  ;;  %47 = vrot.lane.b32.xlu0 %v38_v4, %s879_s30 }
  0x1f   :  { %p855_p12 = pnand %p854_p11, %p848_p8 }
  0x3c   :  { %57 = vxpose.xlu0.b32.start.end [1/1] (short) (narrow) %v56_v5, 8 }
  0x40   :  { %276 = vxpose.xlu0.b32.start.end [1/1] (short) (narrow) %v275_v6, 8 }
  0x44   :  { %412 = vxpose.xlu0.b32.start.end [1/1] (short) (narrow) %v411_v7, 8 }
  0x47   :  { %166 = vxpose.xlu1.b32.start.end [1/1] (short) (narrow) %v45_v8, 8 }
  0x48   :  { %520 = vxpose.xlu0.b32.start.end [1/1] (short) (narrow) %v402_v9, 8 }
  0x4b   :  { %629 = vxpose.xlu1.b32.start.end [1/1] (short) (narrow) %v628_v10, 8 }
  0x71   :  { %824 = vset.pattern.permute.xlu0 %v880_v12 }
  0x72   :  { %386 = vperm.xlu0 %824, %v36_v11  }
  0x88   :  { %v41_v13 = vpop.permute.xlu1 %40  ;;  %v51_v14 = vpop.permute.xlu0 %50 }
  0x89   :  { %392 = vst.msk [vmem:[#allocation2] sm:$0xf] %vm33_vm0, %v41_v13  ;;  %v44_v15 = vsel %vm43_vm2, %v38_v4, %v41_v13 }
  0x8a   :  { %789 = vmatpush3.msk.msra.mxu1 %vm92_vm3, %v44_v15 }
  0x8b   :  { %798 = vmatprep.subr.mxu1 %v876_v0 }
  0x8c   :  { %v399_v16 = vpop.permute.xlu1 %398  ;;  %v408_v17 = vpop.permute.xlu0 %407 }
  0x8d   :  { %740 = vst.msk [vmem:[#allocation2 + $0x4] sm:$0xf] %vm33_vm0, %v399_v16  ;;  %v401_v22 = vsel %vm43_vm2, %v396_v3, %v399_v16 }
  0x90   :  { %v48_v18 = vpop.permute.xlu0 %47  ;;  %v405_v23 = vpop.permute.xlu1 %404 }
  0x91   :  { %v54_v19 = vsel %vm53_vm4, %v48_v18, %v51_v14  ;;  %v410_v26 = vsel %vm53_vm4, %v405_v23, %v408_v17 }
  0x92   :  { %784 = vmatpush3.msk.msra.mxu0 %vm92_vm3, %v54_v19 }
  0x93   :  { %793 = vmatprep.subr.mxu0 %v876_v0 }
  0xbc   :  { %v73_v20 = vpop.trf.xlu0 }
  0xbd   :  { %786 = vmatmul.mubr.msk.f32.vlgmr.msra.gmra.mrb[0].mxu0 %vm43_vm2, %v73_v20 }
  0xbe   :  { %794 = vmatpush3.msk.msra.mxu0 %vm92_vm3, %v37_v1  ;;  %795 = vmatprep.mubr.msk.f32.mxu0 %vm877_vm1, %v876_v0 }
  0xbf   :  { %803 = vmatprep.subr.mxu0 %v876_v0 }
  0xc0   :  { %v292_v21 = vpop.trf.xlu0 }
  0xc1   :  { %796 = vmatmul.mubr.msk.f32.vlgmr.msra.gmra.mrb[2].mxu0 %vm43_vm2, %v292_v21 }
  0xc2   :  { %804 = vmatpush3.msk.msra.mxu0 %vm92_vm3, %v401_v22  ;;  %805 = vmatprep.mubr.msk.f32.mxu0 %vm877_vm1, %v876_v0 }
  0xc4   :  { %v428_v24 = vpop.trf.xlu0 }
  0xc7   :  { %v182_v25 = vpop.trf.xlu1 }
  0xc8   :  { %791 = vmatmul.mubr.msk.f32.vlgmr.msra.gmra.mrb[0].mxu1 %vm43_vm2, %v182_v25  ;;  %v536_v27 = vpop.trf.xlu0 }
  0xc9   :  { %799 = vmatpush3.msk.msra.mxu1 %vm92_vm3, %v410_v26  ;;  %800 = vmatprep.mubr.msk.f32.mxu1 %vm877_vm1, %v876_v0 }
  0xca   :  { %808 = vmatprep.subr.mxu1 %v876_v0  ;;  %806 = vmatmul.mubr.msk.f32.vlgmr.msra.gmra.mrb[4].mxu0 %vm43_vm2, %v536_v27 }
  0xcb   :  { %v645_v28 = vpop.trf.xlu1 }
  0xcc   :  { %801 = vmatmul.mubr.msk.f32.vlgmr.msra.gmra.mrb[2].mxu1 %vm43_vm2, %v428_v24 }
  0xcd   :  { %809 = vmatpush3.msk.msra.mxu1 %vm92_vm3, %v764_v2  ;;  %810 = vmatprep.mubr.msk.f32.mxu1 %vm877_vm1, %v876_v0 }
  0xd0   :  { %811 = vmatmul.mubr.msk.f32.vlgmr.msra.gmra.mrb[4].mxu1 %vm43_vm2, %v645_v28 }
  0xf1   :  { %v387_v37 = vpop.permute.xlu0 %386 }
 0x190   :  { %v162_v29 = vpop.f32.mrb[0].mxu0 }
 0x191   :  { %v787_v30 = vpop.f32.mrb[1].mxu0 }
 0x194   :  { %v379_v31 = vpop.f32.mrb[2].mxu0 }
 0x195   :  { %v797_v32 = vpop.f32.mrb[3].mxu0 }
 0x19b   :  { %v270_v33 = vpop.f32.mrb[0].mxu1 }
 0x19c   :  { %v271_v34 = vadd.f32 %v270_v33, %v162_v29  ;;  %v792_v35 = vpop.f32.mrb[1].mxu1 }
 0x19d   :  { %v624_v36 = vpop.f32.mrb[4].mxu0 }
 0x19e   :  { %v383_v38 = vadd.f32 %v379_v31, %v271_v34  ;;  %v807_v39 = vpop.f32.mrb[5].mxu0 }
 0x19f   :  { %v516_v40 = vpop.f32.mrb[2].mxu1 }
 0x1a0   :  { %v389_v41 = vadd.f32 %v387_v37, %v383_v38  ;;  %v625_v42 = vadd.f32 %v624_v36, %v516_v40  ;;  %v802_v43 = vpop.f32.mrb[3].mxu1 }
 0x1a2   :  { %390 = vst [vmem:[#allocation6] sm:$0xff] %v389_v41 }
 0x1a3   :  { %v732_v44 = vpop.f32.mrb[4].mxu1 }
 0x1a4   :  { %v736_v45 = vadd.f32 %v732_v44, %v625_v42  ;;  %v812_v46 = vpop.f32.mrb[5].mxu1 }
 0x1a6   :  { %v737_v47 = vadd.f32 %v736_v45, %v387_v37 }
 0x1a8   :  { %739 = vst [vmem:[#allocation6 + $0x8] sm:$0xff] %v737_v47 }
 0x1a9   :  { %858 = shalt.err (!%p855_p12)
}
 0x1aa   :  { %s859_s9 = scalar_lea.hbm %s980_s3, 256 }
 0x1ab   :  { %p860_p13 = scmp.ne.s32.totalorder %s980_s3, %s859_s9  ;;  %p863_p0 = scmp.lt.u32.totalorder %s859_s9, %s980_s3 }
 0x1ad   :  { %p865_p1 = pnand %p863_p0, %p860_p13 }
 0x1af   :  { %868 = shalt.err (!%p865_p1)
}
 0x1b0   :  { %s882_s14 = smov 128   ;;  %s883_s15 = smov 8  }
 0x1b1   :  { %752 = dma.vmem_to_hbm [thread:$0]  %s747_s5, 256, %s980_s3, [#allocation5], %s882_s14, %s882_s14, %s883_s15  }
 0x1b2   :  { %871 = dma.done.wait [#allocation5], 256  }
 0x1b3   :  { %872 = vsyncadd [#allocation5], 4294967040 }
 0x1b4   :  { %756 = vsyncpa [#allocation4], 1 }
 0x1b5   :  { %757 = vsyncpa [#allocation5], 1 }

</bundles_post_ra>
